<compile_context>
chip_gen: v6e
topology: v6e:2x2x1
jax: 0.10.0
libtpu: 0.0.40
codegen_flags: <defaults>
</compile_context>

<pallas_src>
import jax
import jax.numpy as jnp
from jax.experimental import pallas as pl
from jax.experimental.pallas import tpu as pltpu


def _round_up(n: int, m: int) -> int:
    return ((n + m - 1) // m) * m


def _affine_kernel(wT_ref, b_ref, xT_ref, outT_ref):
    # wT_ref  : (6, 2)  effective weight (transposed), resident across the grid
    # b_ref   : (6, 1)  effective bias,                resident across the grid
    # xT_ref  : (2, TB) batch tile, batch on the lane axis (pipelined)
    # outT_ref: (6, TB) lane-dense output tile
    x = xT_ref[...]
    w = wT_ref[...]
    # K = 2 -> two VPU broadcast multiply-adds; avoids MXU for a tiny contraction.
    out = w[:, 0:1] * x[0:1, :] + w[:, 1:2] * x[1:2, :] + b_ref[...]
    outT_ref[...] = out.astype(outT_ref.dtype)


def model_forward(x, w1, b1, w2, b2, *, batch_tile=65536,
                  out_dtype=jnp.float32, return_transposed=False):
    """x: (B, 2) f32. w1: (3, 2), b1: (3,), w2: (3, 3), b2: (3,).

    Returns (B, 6) by default (module semantics); (6, B) if return_transposed=True.
    out_dtype=jnp.bfloat16 halves output HBM traffic if the consumer tolerates it.
    """
    B = x.shape[0]

    # Fold Linear(2,3) -> Linear(3,3) -> duplicate/flatten into one (2, 6) affine.
    w_eff = jnp.tile(w1.T @ w2.T, (1, 2))              # (2, 6)
    b_eff = jnp.tile(b1 @ w2.T + b2, (2,))             # (6,)
    wT = w_eff.T.astype(jnp.float32)                   # (6, 2)
    bcol = b_eff.reshape(6, 1).astype(jnp.float32)     # (6, 1)

    # ---- batch (lane) tiling: pad to full tiles, keep >= 4 steps when possible ----
    B128 = _round_up(B, 128)
    tb = min(_round_up(batch_tile, 128), B128)
    if B128 >= 4 * 128:
        # Cap the tile so the grid has >= 4 steps: lets "parallel" semantics shard
        # across v7x's two TensorCores and keeps the pipeline multi-step.
        tb = min(tb, _round_up(pl.cdiv(B128, 4), 128))
    B_pad = _round_up(B128, tb)
    grid = (B_pad // tb,)

    xT = x.T.astype(jnp.float32)                       # (2, B)  batch on lanes
    if B_pad != B:
        xT = jnp.pad(xT, ((0, 0), (0, B_pad - B)))     # padded lanes sliced off below

    out_bytes = 6 * B_pad * jnp.dtype(out_dtype).itemsize
    cost = pl.CostEstimate(
        flops=4 * 6 * B_pad,                           # 2 mul + 2 add per output elem
        transcendentals=0,
        bytes_accessed=2 * 4 * B_pad + out_bytes + 4 * (6 * 2 + 6),
    )

    outT = pl.pallas_call(
        _affine_kernel,
        out_shape=jax.ShapeDtypeStruct((6, B_pad), out_dtype),
        grid=grid,
        in_specs=[
            pl.BlockSpec((6, 2), lambda i: (0, 0)),    # resident effective weight
            pl.BlockSpec((6, 1), lambda i: (0, 0)),    # resident effective bias
            pl.BlockSpec((2, tb), lambda i: (0, i)),   # pipelined batch tile
        ],
        out_specs=pl.BlockSpec((6, tb), lambda i: (0, i)),
        compiler_params=pltpu.CompilerParams(
            dimension_semantics=("parallel",),         # megacore sharding on v7x
        ),
        cost_estimate=cost,
    )(wT, bcol, xT)

    outT = outT[:, :B]                                 # drop padded lanes
    if return_transposed:
        return outT                                    # (6, B) lane-dense slab
    return outT.T                                      # (B, 6) module semantics


def _init_params(key):
    # Deterministic synthetic parameters matching nn.Linear(2,3) and nn.Linear(3,3).
    k1, k2, k3, k4 = jax.random.split(key, 4)
    bound1 = 1.0 / jnp.sqrt(2.0)
    bound2 = 1.0 / jnp.sqrt(3.0)
    w1 = jax.random.uniform(k1, (3, 2), jnp.float32, -bound1, bound1)
    b1 = jax.random.uniform(k2, (3,), jnp.float32, -bound1, bound1)
    w2 = jax.random.uniform(k3, (3, 3), jnp.float32, -bound2, bound2)
    b2 = jax.random.uniform(k4, (3,), jnp.float32, -bound2, bound2)
    return w1, b1, w2, b2


if __name__ == "__main__":
    key = jax.random.PRNGKey(0)
    kx, kp = jax.random.split(key)
    x = jax.random.normal(kx, (2, 2), jnp.float32)     # matches torch.randn(2, 2)
    w1, b1, w2, b2 = _init_params(kp)

    out = jax.block_until_ready(model_forward(x, w1, b1, w2, b2))

    # Plain-JAX reference of the (documented) semantics.
    h_ref = x @ w1.T + b1
    y_ref = h_ref @ w2.T + b2
    ref = jnp.concatenate([y_ref, y_ref], axis=-1)
    assert out.shape == (2, 6)
    assert jnp.allclose(out, ref, atol=1e-5, rtol=1e-5)

    print("KERNEL_OK")
</pallas_src>

<mosaic_0001>
module attributes {stable_mosaic.version = 11 : i64} {
  func.func @_affine_kernel(%arg0: i32, %arg1: memref<6x2xf32, #tpu.memory_space<vmem>>, %arg2: memref<6x1xf32, #tpu.memory_space<vmem>>, %arg3: memref<2x128xf32, #tpu.memory_space<vmem>>, %arg4: memref<6x128xf32, #tpu.memory_space<vmem>>) attributes {dimension_semantics = [#tpu.dimension_semantics<parallel>], iteration_bounds = array<i64: 1>, scalar_prefetch = 0 : i64, scratch_operands = 0 : i64, tpu.core_type = #tpu.core_type<tc>, window_params = [{pipeline_mode = #tpu.pipeline_mode<synchronous>, transform_indices = @transform_0, window_bounds = array<i64: 6, 2>}, {pipeline_mode = #tpu.pipeline_mode<synchronous>, transform_indices = @transform_1, window_bounds = array<i64: 6, 1>}, {transform_indices = @transform_2, window_bounds = array<i64: 2, 128>}, {transform_indices = @transform_3, window_bounds = array<i64: 6, 128>}]} {
    %c0 = arith.constant 0 : index
    %c0_0 = arith.constant 0 : index
    %0 = vector.load %arg3[%c0, %c0_0] : memref<2x128xf32, #tpu.memory_space<vmem>>, vector<2x128xf32>
    %c0_1 = arith.constant 0 : index
    %c0_2 = arith.constant 0 : index
    %1 = vector.load %arg1[%c0_1, %c0_2] : memref<6x2xf32, #tpu.memory_space<vmem>>, vector<6x2xf32>
    %2 = vector.extract_strided_slice %1 {offsets = [0, 0], sizes = [6, 1], strides = [1, 1]} : vector<6x2xf32> to vector<6x1xf32>
    %3 = vector.extract_strided_slice %0 {offsets = [0, 0], sizes = [1, 128], strides = [1, 1]} : vector<2x128xf32> to vector<1x128xf32>
    %4 = vector.broadcast %2 : vector<6x1xf32> to vector<6x128xf32>
    %5 = vector.broadcast %3 : vector<1x128xf32> to vector<6x128xf32>
    %6 = arith.mulf %4, %5 : vector<6x128xf32>
    %7 = vector.extract_strided_slice %1 {offsets = [0, 1], sizes = [6, 1], strides = [1, 1]} : vector<6x2xf32> to vector<6x1xf32>
    %8 = vector.extract_strided_slice %0 {offsets = [1, 0], sizes = [1, 128], strides = [1, 1]} : vector<2x128xf32> to vector<1x128xf32>
    %9 = vector.broadcast %7 : vector<6x1xf32> to vector<6x128xf32>
    %10 = vector.broadcast %8 : vector<1x128xf32> to vector<6x128xf32>
    %11 = arith.mulf %9, %10 : vector<6x128xf32>
    %12 = arith.addf %6, %11 : vector<6x128xf32>
    %c0_3 = arith.constant 0 : index
    %c0_4 = arith.constant 0 : index
    %13 = vector.load %arg2[%c0_3, %c0_4] : memref<6x1xf32, #tpu.memory_space<vmem>>, vector<6x1xf32>
    %14 = vector.broadcast %13 : vector<6x1xf32> to vector<6x128xf32>
    %15 = arith.addf %12, %14 : vector<6x128xf32>
    %c0_5 = arith.constant 0 : index
    %c0_6 = arith.constant 0 : index
    %16 = vector.load %arg4[%c0_5, %c0_6] : memref<6x128xf32, #tpu.memory_space<vmem>>, vector<6x128xf32>
    tpu.vector_store %arg4[%c0_5, %c0_6], %15 {strides = array<i32>} : memref<6x128xf32, #tpu.memory_space<vmem>>, vector<6x128xf32>,
    return
  }
  func.func @transform_0(%arg0: i32) -> (i32, i32) {
    %c0_i32 = arith.constant 0 : i32
    %c0_i32_0 = arith.constant 0 : i32
    %c0_i32_1 = arith.constant 0 : i32
    return %c0_i32, %c0_i32_0 : i32, i32
  }
  func.func @transform_1(%arg0: i32) -> (i32, i32) {
    %c0_i32 = arith.constant 0 : i32
    %c0_i32_0 = arith.constant 0 : i32
    %c0_i32_1 = arith.constant 0 : i32
    return %c0_i32, %c0_i32_0 : i32, i32
  }
  func.func @transform_2(%arg0: i32) -> (i32, i32) {
    %c0_i32 = arith.constant 0 : i32
    %c0_i32_0 = arith.constant 0 : i32
    return %c0_i32, %arg0 : i32, i32
  }
  func.func @transform_3(%arg0: i32) -> (i32, i32) {
    %c0_i32 = arith.constant 0 : i32
    %c0_i32_0 = arith.constant 0 : i32
    return %c0_i32, %arg0 : i32, i32
  }
}

</mosaic_0001>

<bundles_post_ra>
// kernel: tpu_custom_call.1
= control target key start
LH: loop header
LB: loop body
LE: loop exit
PB: predicated region body
PF: predicated region fallthrough
CT: control target
= control target key end

     0   :  { %v88_v2 = vmov 0   ;;  %s123_s0 = inlined_call_operand.vmem [shape: f32[6,2], index: 0, kind: input, shape index: {}]   ;;  %s124_s1 = inlined_call_operand.vmem [shape: f32[6,1], index: 1, kind: input, shape index: {}]   ;;  %s125_s2 = inlined_call_operand.vmem [shape: f32[2,128], index: 2, kind: input, shape index: {}]   ;;  %s126_s3 = inlined_call_operand.hbm [shape: f32[6,128], index: 3, kind: output, shape index: {}]  }
   0x1   :  { %v16_v0 = vld [vmem:[%s123_s0] sm:$0x3f]  ;;  %62 = vset.pattern.permute.xlu0 %v88_v2  ;;  %64 = vset.pattern.permute.xlu1 %v88_v2 }
   0x2   :  { %v37_v1 = vld [vmem:[%s124_s1] sm:$0x3f] }
   0x3   :  { %8 = vsyncpa [#allocation3], 0  ;;  %19 = vperm.xlu0 %62, %v16_v0   ;;  %40 = vperm.xlu1 %64, %v37_v1   ;;  %v89_v3 = vmov 1   ;;  %v22_v4 = vlaneseq  ;;  %v15_v8 = vld [vmem:[%s125_s2] sm:$0x3]  ;;  %s90_s1 = smov [#allocation2]  }
   0x4   :  { %s51_s17 = sshll.u32 %s90_s1, 4  ;;  %s52_s17 = int_to_ptr.vmem [resolvable:$true] %s51_s17 }
   0x5   :  { %v23_v5 = vshrl.u32 %v22_v4, 7  ;;  %s66_s18 = scalar_lea.vmem %s52_s17, 128  ;;  %p71_p1 = scmp.lt.s32.totalorder %s52_s17, %s52_s17 }
   0x6   :  { %p67_p0 = scmp.ne.s32.totalorder %s52_s17, %s66_s18  ;;  %p72_p2 = scmp.lt.s32.totalorder %s66_s18, %s66_s18 }
   0x7   :  { %63 = vset.pattern.permute.xlu0 %v89_v3  ;;  %v24_v6 = vsub.s32 0, %v23_v5  ;;  %v33_v7 = vsub.s32 1, %v23_v5 }
   0x8   :  { %28 = vperm.xlu0 %63, %v16_v0   ;;  %p73_p3 = por %p72_p2, %p71_p1 }
   0x9   :  { %v25_v10 = vrot.slane %v15_v8, %v24_v6  ;;  %v34_v11 = vrot.slane %v15_v8, %v33_v7 }
   0xa   :  { %p74_p4 = pnand %p73_p3, %p67_p0 }
   0xc   :  { %65 = vset.pattern.permute.xlu0 %v88_v2 }
  0x7e   :  { %v20_v9 = vpop.permute.xlu0 %19  ;;  %v41_v15 = vpop.permute.xlu1 %40 }
  0x7f   :  { %v26_v13 = vmul.f32 %v25_v10, %v20_v9 }
  0x83   :  { %v29_v12 = vpop.permute.xlu0 %28 }
  0x84   :  { %v35_v14 = vmul.f32 %v34_v11, %v29_v12 }
  0x86   :  { %v36_v16 = vadd.f32 %v35_v14, %v26_v13 }
  0x88   :  { %v43_v17 = vadd.f32 %v41_v15, %v36_v16 }
  0x8a   :  { %44 = vst [vmem:[#allocation2] sm:$0x3f] %v43_v17 }
  0x8b   :  { %77 = shalt.err (!%p74_p4)
}
  0x8c   :  { %54 = dma.vmem_to_hbm [thread:$0]  %s52_s17, 128, %s126_s3, [#allocation3]  }
  0x8d   :  { %86 = dma.done.wait [#allocation3], 128  }
  0x8e   :  { %87 = vsyncadd [#allocation3], 4294967168 }
  0x8f   :  { %58 = vsyncpa [#allocation3], 1 }

</bundles_post_ra>
